<compile_context>
chip_gen: v7x
topology: tpu7x:2x2x1
jax: 0.10.0
libtpu: 0.0.40
codegen_flags: <defaults>
</compile_context>

<pallas_src>
import functools

import jax
import jax.numpy as jnp
from jax.experimental import pallas as pl
from jax.experimental.pallas import tpu as pltpu


# ----------------------------------------------------------------------------
# Fused kernel: one batch element per grid step, everything VMEM-resident.
# ----------------------------------------------------------------------------
def _resblock_kernel(x_ref, w1_ref, b1_ref, w2_ref, b2_ref, w3_ref, b3_ref,
                     wd_ref, bd_ref, o_ref, padx_ref, padm_ref, *, H):
    """Fused ResBlock forward for one batch element.

    x_ref : (1, H, W*Cin)   lane-dense input
    wK_ref: (3, W*Cin_k, W*Cout_k)   banded per-kh weights (BN scale folded in)
    bK_ref: (1, W*Cout_k)            lane-tiled BN bias
    wd_ref: (W*Cin, W*Cout)          block-diagonal 1x1 downsample weight
    o_ref : (1, H, W*Cout)           lane-dense output
    padx_ref: (H+2, W*Cin)  VMEM scratch (H-halo for conv1 input)
    padm_ref: (H+2, W*Cmid) VMEM scratch (H-halo, reused for conv2/conv3 input)
    """
    f32 = jnp.float32
    zx = jnp.zeros((1, padx_ref.shape[1]), f32)
    zm = jnp.zeros((1, padm_ref.shape[1]), f32)

    # ---- conv1: 3x3 + BN + ReLU --------------------------------------------
    padx_ref[0:1, :] = zx
    padx_ref[H + 1:H + 2, :] = zx
    padx_ref[1:H + 1, :] = x_ref[0]

    acc = jnp.dot(padx_ref[0:H, :], w1_ref[0], preferred_element_type=f32)
    acc += jnp.dot(padx_ref[1:H + 1, :], w1_ref[1], preferred_element_type=f32)
    acc += jnp.dot(padx_ref[2:H + 2, :], w1_ref[2], preferred_element_type=f32)
    y = jnp.maximum(acc + b1_ref[...], 0.0)

    # ---- conv2: 3x3 + BN + ReLU --------------------------------------------
    padm_ref[0:1, :] = zm
    padm_ref[H + 1:H + 2, :] = zm
    padm_ref[1:H + 1, :] = y

    acc = jnp.dot(padm_ref[0:H, :], w2_ref[0], preferred_element_type=f32)
    acc += jnp.dot(padm_ref[1:H + 1, :], w2_ref[1], preferred_element_type=f32)
    acc += jnp.dot(padm_ref[2:H + 2, :], w2_ref[2], preferred_element_type=f32)
    y = jnp.maximum(acc + b2_ref[...], 0.0)

    # ---- conv3: 3x3 + BN + ReLU (reuse padm; halo rows already zero) -------
    padm_ref[1:H + 1, :] = y

    acc = jnp.dot(padm_ref[0:H, :], w3_ref[0], preferred_element_type=f32)
    acc += jnp.dot(padm_ref[1:H + 1, :], w3_ref[1], preferred_element_type=f32)
    acc += jnp.dot(padm_ref[2:H + 2, :], w3_ref[2], preferred_element_type=f32)
    y = jnp.maximum(acc + b3_ref[...], 0.0)

    # ---- downsample (1x1 + BN + ReLU) + residual add ------------------------
    idn = jnp.dot(x_ref[0], wd_ref[...], preferred_element_type=f32)
    idn = jnp.maximum(idn + bd_ref[...], 0.0)

    # Dropout(p=0.0) == Identity.
    o_ref[0] = (y + idn).astype(o_ref.dtype)


# ----------------------------------------------------------------------------
# Host-side weight preparation: BN folding + banded lane-dense weights.
# ----------------------------------------------------------------------------
def fold_bn(gamma, beta, mean, var, eps=1e-5):
    scale = gamma / jnp.sqrt(var + eps)
    bias = beta - mean * scale
    return scale, bias


def _make_banded(w_k_ci_co, W, center):
    """(K, Cin, Cout) filter row -> banded (W*Cin, W*Cout) matrix.

    M[wi*Cin + ci, wo*Cout + co] = w[wi - wo + center, ci, co] if tap valid else 0.
    """
    K, Cin, Cout = w_k_ci_co.shape
    wi = jnp.arange(W)[:, None]
    wo = jnp.arange(W)[None, :]
    kidx = wi - wo + center
    valid = (kidx >= 0) & (kidx < K)
    blocks = w_k_ci_co[jnp.clip(kidx, 0, K - 1)]               # (W, W, Cin, Cout)
    blocks = jnp.where(valid[:, :, None, None], blocks, 0.0)
    return blocks.transpose(0, 2, 1, 3).reshape(W * Cin, W * Cout)


def prepare_params(params, W):
    """Fold BN scale into weights; build banded weights + lane-tiled biases."""
    prep = {}
    for name in ("conv1", "conv2", "conv3"):
        p = params[name]
        w = p["w"] * p["scale"][None, None, None, :]           # HWIO, scale folded
        wb = jnp.stack([_make_banded(w[kh], W, center=1) for kh in range(3)])
        prep[name] = {"w": wb, "b": jnp.tile(p["bias"], W)[None, :]}
    p = params["down"]
    wd = p["w"] * p["scale"][None, :]                          # (Cin, Cout)
    prep["down"] = {"w": _make_banded(wd[None], W, center=0),
                    "b": jnp.tile(p["bias"], W)[None, :]}
    return prep


# ----------------------------------------------------------------------------
# ResBlock forward (wrapper takes NCHW like PyTorch)
# ----------------------------------------------------------------------------
def resblock_forward(x_nchw, params):
    B, Cin, H, W = x_nchw.shape
    Cmid = params["conv1"]["w"].shape[-1]
    Cout = params["conv3"]["w"].shape[-1]
    prep = prepare_params(params, W)

    # NCHW -> NHWC -> lane-dense (B, H, W*Cin)
    x = jnp.transpose(x_nchw, (0, 2, 3, 1)).reshape(B, H, W * Cin)

    def const_spec(shape):
        return pl.BlockSpec(shape, lambda b, _s=shape: (0,) * len(_s))

    kernel = functools.partial(_resblock_kernel, H=H)
    out2 = pl.pallas_call(
        kernel,
        out_shape=jax.ShapeDtypeStruct((B, H, W * Cout), jnp.float32),
        grid_spec=pltpu.PrefetchScalarGridSpec(
            num_scalar_prefetch=0,
            grid=(B,),
            in_specs=[
                pl.BlockSpec((1, H, W * Cin), lambda b: (b, 0, 0)),
                const_spec((3, W * Cin, W * Cmid)),  const_spec((1, W * Cmid)),
                const_spec((3, W * Cmid, W * Cmid)), const_spec((1, W * Cmid)),
                const_spec((3, W * Cmid, W * Cout)), const_spec((1, W * Cout)),
                const_spec((W * Cin, W * Cout)),     const_spec((1, W * Cout)),
            ],
            out_specs=pl.BlockSpec((1, H, W * Cout), lambda b: (b, 0, 0)),
            scratch_shapes=[
                pltpu.VMEM((H + 2, W * Cin), jnp.float32),   # conv1 padded input
                pltpu.VMEM((H + 2, W * Cmid), jnp.float32),  # conv2/conv3 padded input
            ],
        ),
        compiler_params=pltpu.CompilerParams(dimension_semantics=("parallel",)),
    )(x,
      prep["conv1"]["w"], prep["conv1"]["b"],
      prep["conv2"]["w"], prep["conv2"]["b"],
      prep["conv3"]["w"], prep["conv3"]["b"],
      prep["down"]["w"], prep["down"]["b"])

    out = out2.reshape(B, H, W, Cout)
    return jnp.transpose(out, (0, 3, 1, 2))  # NHWC -> NCHW


# ----------------------------------------------------------------------------
# Parameter construction (deterministic, synthetic)
# ----------------------------------------------------------------------------
def make_cna_params(key, cin, cout, ksize):
    kw, kg, kb, km, kv = jax.random.split(key, 5)
    if ksize == 3:
        w = jax.random.normal(kw, (3, 3, cin, cout), jnp.float32) * 0.1
    else:
        w = jax.random.normal(kw, (cin, cout), jnp.float32) * 0.1
    gamma = 1.0 + 0.1 * jax.random.normal(kg, (cout,), jnp.float32)
    beta = 0.1 * jax.random.normal(kb, (cout,), jnp.float32)
    mean = 0.1 * jax.random.normal(km, (cout,), jnp.float32)
    var = 0.5 + jnp.abs(jax.random.normal(kv, (cout,), jnp.float32))
    scale, bias = fold_bn(gamma, beta, mean, var)
    return {"w": w, "scale": scale, "bias": bias}


# ----------------------------------------------------------------------------
# Pure-JAX reference for correctness
# ----------------------------------------------------------------------------
def _ref_cna(x_nhwc, w, scale, bias, ksize):
    if ksize == 1:
        w = w.reshape(1, 1, *w.shape)
    pad = 1 if ksize == 3 else 0
    y = jax.lax.conv_general_dilated(
        x_nhwc, w, window_strides=(1, 1), padding=[(pad, pad), (pad, pad)],
        dimension_numbers=("NHWC", "HWIO", "NHWC"))
    y = y * scale.reshape(1, 1, 1, -1) + bias.reshape(1, 1, 1, -1)
    return jnp.maximum(y, 0.0)


def resblock_reference(x_nchw, params):
    x = jnp.transpose(x_nchw, (0, 2, 3, 1))
    out = _ref_cna(x, params["conv1"]["w"], params["conv1"]["scale"], params["conv1"]["bias"], 3)
    out = _ref_cna(out, params["conv2"]["w"], params["conv2"]["scale"], params["conv2"]["bias"], 3)
    out = _ref_cna(out, params["conv3"]["w"], params["conv3"]["scale"], params["conv3"]["bias"], 3)
    identity = _ref_cna(x, params["down"]["w"], params["down"]["scale"], params["down"]["bias"], 1)
    return jnp.transpose(out + identity, (0, 3, 1, 2))


# ----------------------------------------------------------------------------
if __name__ == "__main__":
    B, Cin, H, W = 2, 4, 16, 16
    Cout = 8  # ouplanes (mdplanes == ouplanes in the module)

    key = jax.random.PRNGKey(0)
    kx, k1, k2, k3, k4 = jax.random.split(key, 5)

    x = jax.random.normal(kx, (B, Cin, H, W), jnp.float32)  # NCHW, PyTorch convention

    params = {
        "conv1": make_cna_params(k1, Cin, Cout, 3),
        "conv2": make_cna_params(k2, Cout, Cout, 3),
        "conv3": make_cna_params(k3, Cout, Cout, 3),
        # downsample = ConvNormAct(inplanes, ouplanes, kernel_size=1, padding=0)
        "down": make_cna_params(k4, Cin, Cout, 1),
    }

    out = jax.block_until_ready(resblock_forward(x, params))
    ref = jax.block_until_ready(resblock_reference(x, params))

    assert out.shape == (B, Cout, H, W)
    assert jnp.allclose(out, ref, rtol=1e-4, atol=1e-4), float(jnp.max(jnp.abs(out - ref)))

    print("KERNEL_OK")
</pallas_src>

<mosaic_0001>
module attributes {stable_mosaic.version = 11 : i64} {
  func.func @_resblock_kernel(%arg0: i32, %arg1: memref<1x16x64xf32, #tpu.memory_space<vmem>>, %arg2: memref<3x64x128xf32, #tpu.memory_space<vmem>>, %arg3: memref<1x128xf32, #tpu.memory_space<vmem>>, %arg4: memref<3x128x128xf32, #tpu.memory_space<vmem>>, %arg5: memref<1x128xf32, #tpu.memory_space<vmem>>, %arg6: memref<3x128x128xf32, #tpu.memory_space<vmem>>, %arg7: memref<1x128xf32, #tpu.memory_space<vmem>>, %arg8: memref<64x128xf32, #tpu.memory_space<vmem>>, %arg9: memref<1x128xf32, #tpu.memory_space<vmem>>, %arg10: memref<1x16x128xf32, #tpu.memory_space<vmem>>, %arg11: memref<18x64xf32, #tpu.memory_space<vmem>>, %arg12: memref<18x128xf32, #tpu.memory_space<vmem>>) attributes {dimension_semantics = [#tpu.dimension_semantics<parallel>], iteration_bounds = array<i64: 2>, scalar_prefetch = 0 : i64, scratch_operands = 2 : i64, tpu.core_type = #tpu.core_type<tc>, window_params = [{transform_indices = @transform_0, window_bounds = array<i64: 1, 16, 64>}, {pipeline_mode = #tpu.pipeline_mode<synchronous>, transform_indices = @transform_1, window_bounds = array<i64: 3, 64, 128>}, {pipeline_mode = #tpu.pipeline_mode<synchronous>, transform_indices = @transform_2, window_bounds = array<i64: 1, 128>}, {pipeline_mode = #tpu.pipeline_mode<synchronous>, transform_indices = @transform_3, window_bounds = array<i64: 3, 128, 128>}, {pipeline_mode = #tpu.pipeline_mode<synchronous>, transform_indices = @transform_4, window_bounds = array<i64: 1, 128>}, {pipeline_mode = #tpu.pipeline_mode<synchronous>, transform_indices = @transform_5, window_bounds = array<i64: 3, 128, 128>}, {pipeline_mode = #tpu.pipeline_mode<synchronous>, transform_indices = @transform_6, window_bounds = array<i64: 1, 128>}, {pipeline_mode = #tpu.pipeline_mode<synchronous>, transform_indices = @transform_7, window_bounds = array<i64: 64, 128>}, {pipeline_mode = #tpu.pipeline_mode<synchronous>, transform_indices = @transform_8, window_bounds = array<i64: 1, 128>}, {transform_indices = @transform_9, window_bounds = array<i64: 1, 16, 128>}]} {
    %cst = arith.constant 0.000000e+00 : f32
    %0 = vector.broadcast %cst : f32 to vector<1x64xf32>
    %cst_0 = arith.constant 0.000000e+00 : f32
    %1 = vector.broadcast %cst_0 : f32 to vector<1x128xf32>
    %c0 = arith.constant 0 : index
    %c0_1 = arith.constant 0 : index
    %2 = vector.load %arg11[%c0, %c0_1] : memref<18x64xf32, #tpu.memory_space<vmem>>, vector<1x64xf32>
    tpu.vector_store %arg11[%c0, %c0_1], %0 {strides = array<i32>} : memref<18x64xf32, #tpu.memory_space<vmem>>, vector<1x64xf32>,
    %c17 = arith.constant 17 : index
    %c0_2 = arith.constant 0 : index
    %3 = vector.load %arg11[%c17, %c0_2] : memref<18x64xf32, #tpu.memory_space<vmem>>, vector<1x64xf32>
    tpu.vector_store %arg11[%c17, %c0_2], %0 {strides = array<i32>} : memref<18x64xf32, #tpu.memory_space<vmem>>, vector<1x64xf32>,
    %c0_3 = arith.constant 0 : index
    %c0_4 = arith.constant 0 : index
    %c0_5 = arith.constant 0 : index
    %4 = vector.load %arg1[%c0_3, %c0_4, %c0_5] : memref<1x16x64xf32, #tpu.memory_space<vmem>>, vector<1x16x64xf32>
    %5 = vector.shape_cast %4 : vector<1x16x64xf32> to vector<16x64xf32>
    %c1 = arith.constant 1 : index
    %c0_6 = arith.constant 0 : index
    %6 = vector.load %arg11[%c1, %c0_6] : memref<18x64xf32, #tpu.memory_space<vmem>>, vector<16x64xf32>
    tpu.vector_store %arg11[%c1, %c0_6], %5 {strides = array<i32>} : memref<18x64xf32, #tpu.memory_space<vmem>>, vector<16x64xf32>,
    %c0_7 = arith.constant 0 : index
    %c0_8 = arith.constant 0 : index
    %7 = vector.load %arg11[%c0_7, %c0_8] : memref<18x64xf32, #tpu.memory_space<vmem>>, vector<16x64xf32>
    %c0_9 = arith.constant 0 : index
    %c0_10 = arith.constant 0 : index
    %c0_11 = arith.constant 0 : index
    %8 = vector.load %arg2[%c0_9, %c0_10, %c0_11] : memref<3x64x128xf32, #tpu.memory_space<vmem>>, vector<1x64x128xf32>
    %9 = vector.shape_cast %8 : vector<1x64x128xf32> to vector<64x128xf32>
    %cst_12 = arith.constant dense<0.000000e+00> : vector<16x128xf32>
    %10 = tpu.matmul %7, %9, %cst_12 {dimension_numbers = #tpu.dot_dimension_numbers<[1], [0], [0], [1], [0, 0, 1, 1], [], []>} : vector<16x64xf32>, vector<64x128xf32>, vector<16x128xf32> -> vector<16x128xf32>
    %c1_13 = arith.constant 1 : index
    %c0_14 = arith.constant 0 : index
    %11 = vector.load %arg11[%c1_13, %c0_14] : memref<18x64xf32, #tpu.memory_space<vmem>>, vector<16x64xf32>
    %c1_15 = arith.constant 1 : index
    %c0_16 = arith.constant 0 : index
    %c0_17 = arith.constant 0 : index
    %12 = vector.load %arg2[%c1_15, %c0_16, %c0_17] : memref<3x64x128xf32, #tpu.memory_space<vmem>>, vector<1x64x128xf32>
    %13 = vector.shape_cast %12 : vector<1x64x128xf32> to vector<64x128xf32>
    %cst_18 = arith.constant dense<0.000000e+00> : vector<16x128xf32>
    %14 = tpu.matmul %11, %13, %cst_18 {dimension_numbers = #tpu.dot_dimension_numbers<[1], [0], [0], [1], [0, 0, 1, 1], [], []>} : vector<16x64xf32>, vector<64x128xf32>, vector<16x128xf32> -> vector<16x128xf32>
    %15 = arith.addf %10, %14 : vector<16x128xf32>
    %c2 = arith.constant 2 : index
    %c0_19 = arith.constant 0 : index
    %16 = vector.load %arg11[%c2, %c0_19] : memref<18x64xf32, #tpu.memory_space<vmem>>, vector<16x64xf32>
    %c2_20 = arith.constant 2 : index
    %c0_21 = arith.constant 0 : index
    %c0_22 = arith.constant 0 : index
    %17 = vector.load %arg2[%c2_20, %c0_21, %c0_22] : memref<3x64x128xf32, #tpu.memory_space<vmem>>, vector<1x64x128xf32>
    %18 = vector.shape_cast %17 : vector<1x64x128xf32> to vector<64x128xf32>
    %cst_23 = arith.constant dense<0.000000e+00> : vector<16x128xf32>
    %19 = tpu.matmul %16, %18, %cst_23 {dimension_numbers = #tpu.dot_dimension_numbers<[1], [0], [0], [1], [0, 0, 1, 1], [], []>} : vector<16x64xf32>, vector<64x128xf32>, vector<16x128xf32> -> vector<16x128xf32>
    %20 = arith.addf %15, %19 : vector<16x128xf32>
    %c0_24 = arith.constant 0 : index
    %c0_25 = arith.constant 0 : index
    %21 = vector.load %arg3[%c0_24, %c0_25] : memref<1x128xf32, #tpu.memory_space<vmem>>, vector<1x128xf32>
    %22 = vector.broadcast %21 : vector<1x128xf32> to vector<16x128xf32>
    %23 = arith.addf %20, %22 : vector<16x128xf32>
    %cst_26 = arith.constant 0.000000e+00 : f32
    %24 = vector.broadcast %cst_26 : f32 to vector<16x128xf32>
    %25 = arith.maximumf %23, %24 : vector<16x128xf32>
    %c0_27 = arith.constant 0 : index
    %c0_28 = arith.constant 0 : index
    %26 = vector.load %arg12[%c0_27, %c0_28] : memref<18x128xf32, #tpu.memory_space<vmem>>, vector<1x128xf32>
    tpu.vector_store %arg12[%c0_27, %c0_28], %1 {strides = array<i32>} : memref<18x128xf32, #tpu.memory_space<vmem>>, vector<1x128xf32>,
    %c17_29 = arith.constant 17 : index
    %c0_30 = arith.constant 0 : index
    %27 = vector.load %arg12[%c17_29, %c0_30] : memref<18x128xf32, #tpu.memory_space<vmem>>, vector<1x128xf32>
    tpu.vector_store %arg12[%c17_29, %c0_30], %1 {strides = array<i32>} : memref<18x128xf32, #tpu.memory_space<vmem>>, vector<1x128xf32>,
    %c1_31 = arith.constant 1 : index
    %c0_32 = arith.constant 0 : index
    %28 = vector.load %arg12[%c1_31, %c0_32] : memref<18x128xf32, #tpu.memory_space<vmem>>, vector<16x128xf32>
    tpu.vector_store %arg12[%c1_31, %c0_32], %25 {strides = array<i32>} : memref<18x128xf32, #tpu.memory_space<vmem>>, vector<16x128xf32>,
    %c0_33 = arith.constant 0 : index
    %c0_34 = arith.constant 0 : index
    %29 = vector.load %arg12[%c0_33, %c0_34] : memref<18x128xf32, #tpu.memory_space<vmem>>, vector<16x128xf32>
    %c0_35 = arith.constant 0 : index
    %c0_36 = arith.constant 0 : index
    %c0_37 = arith.constant 0 : index
    %30 = vector.load %arg4[%c0_35, %c0_36, %c0_37] : memref<3x128x128xf32, #tpu.memory_space<vmem>>, vector<1x128x128xf32>
    %31 = vector.shape_cast %30 : vector<1x128x128xf32> to vector<128x128xf32>
    %cst_38 = arith.constant dense<0.000000e+00> : vector<16x128xf32>
    %32 = tpu.matmul %29, %31, %cst_38 {dimension_numbers = #tpu.dot_dimension_numbers<[1], [0], [0], [1], [0, 0, 1, 1], [], []>} : vector<16x128xf32>, vector<128x128xf32>, vector<16x128xf32> -> vector<16x128xf32>
    %c1_39 = arith.constant 1 : index
    %c0_40 = arith.constant 0 : index
    %33 = vector.load %arg12[%c1_39, %c0_40] : memref<18x128xf32, #tpu.memory_space<vmem>>, vector<16x128xf32>
    %c1_41 = arith.constant 1 : index
    %c0_42 = arith.constant 0 : index
    %c0_43 = arith.constant 0 : index
    %34 = vector.load %arg4[%c1_41, %c0_42, %c0_43] : memref<3x128x128xf32, #tpu.memory_space<vmem>>, vector<1x128x128xf32>
    %35 = vector.shape_cast %34 : vector<1x128x128xf32> to vector<128x128xf32>
    %cst_44 = arith.constant dense<0.000000e+00> : vector<16x128xf32>
    %36 = tpu.matmul %33, %35, %cst_44 {dimension_numbers = #tpu.dot_dimension_numbers<[1], [0], [0], [1], [0, 0, 1, 1], [], []>} : vector<16x128xf32>, vector<128x128xf32>, vector<16x128xf32> -> vector<16x128xf32>
    %37 = arith.addf %32, %36 : vector<16x128xf32>
    %c2_45 = arith.constant 2 : index
    %c0_46 = arith.constant 0 : index
    %38 = vector.load %arg12[%c2_45, %c0_46] : memref<18x128xf32, #tpu.memory_space<vmem>>, vector<16x128xf32>
    %c2_47 = arith.constant 2 : index
    %c0_48 = arith.constant 0 : index
    %c0_49 = arith.constant 0 : index
    %39 = vector.load %arg4[%c2_47, %c0_48, %c0_49] : memref<3x128x128xf32, #tpu.memory_space<vmem>>, vector<1x128x128xf32>
    %40 = vector.shape_cast %39 : vector<1x128x128xf32> to vector<128x128xf32>
    %cst_50 = arith.constant dense<0.000000e+00> : vector<16x128xf32>
    %41 = tpu.matmul %38, %40, %cst_50 {dimension_numbers = #tpu.dot_dimension_numbers<[1], [0], [0], [1], [0, 0, 1, 1], [], []>} : vector<16x128xf32>, vector<128x128xf32>, vector<16x128xf32> -> vector<16x128xf32>
    %42 = arith.addf %37, %41 : vector<16x128xf32>
    %c0_51 = arith.constant 0 : index
    %c0_52 = arith.constant 0 : index
    %43 = vector.load %arg5[%c0_51, %c0_52] : memref<1x128xf32, #tpu.memory_space<vmem>>, vector<1x128xf32>
    %44 = vector.broadcast %43 : vector<1x128xf32> to vector<16x128xf32>
    %45 = arith.addf %42, %44 : vector<16x128xf32>
    %cst_53 = arith.constant 0.000000e+00 : f32
    %46 = vector.broadcast %cst_53 : f32 to vector<16x128xf32>
    %47 = arith.maximumf %45, %46 : vector<16x128xf32>
    %c1_54 = arith.constant 1 : index
    %c0_55 = arith.constant 0 : index
    %48 = vector.load %arg12[%c1_54, %c0_55] : memref<18x128xf32, #tpu.memory_space<vmem>>, vector<16x128xf32>
    tpu.vector_store %arg12[%c1_54, %c0_55], %47 {strides = array<i32>} : memref<18x128xf32, #tpu.memory_space<vmem>>, vector<16x128xf32>,
    %c0_56 = arith.constant 0 : index
    %c0_57 = arith.constant 0 : index
    %49 = vector.load %arg12[%c0_56, %c0_57] : memref<18x128xf32, #tpu.memory_space<vmem>>, vector<16x128xf32>
    %c0_58 = arith.constant 0 : index
    %c0_59 = arith.constant 0 : index
    %c0_60 = arith.constant 0 : index
    %50 = vector.load %arg6[%c0_58, %c0_59, %c0_60] : memref<3x128x128xf32, #tpu.memory_space<vmem>>, vector<1x128x128xf32>
    %51 = vector.shape_cast %50 : vector<1x128x128xf32> to vector<128x128xf32>
    %cst_61 = arith.constant dense<0.000000e+00> : vector<16x128xf32>
    %52 = tpu.matmul %49, %51, %cst_61 {dimension_numbers = #tpu.dot_dimension_numbers<[1], [0], [0], [1], [0, 0, 1, 1], [], []>} : vector<16x128xf32>, vector<128x128xf32>, vector<16x128xf32> -> vector<16x128xf32>
    %c1_62 = arith.constant 1 : index
    %c0_63 = arith.constant 0 : index
    %53 = vector.load %arg12[%c1_62, %c0_63] : memref<18x128xf32, #tpu.memory_space<vmem>>, vector<16x128xf32>
    %c1_64 = arith.constant 1 : index
    %c0_65 = arith.constant 0 : index
    %c0_66 = arith.constant 0 : index
    %54 = vector.load %arg6[%c1_64, %c0_65, %c0_66] : memref<3x128x128xf32, #tpu.memory_space<vmem>>, vector<1x128x128xf32>
    %55 = vector.shape_cast %54 : vector<1x128x128xf32> to vector<128x128xf32>
    %cst_67 = arith.constant dense<0.000000e+00> : vector<16x128xf32>
    %56 = tpu.matmul %53, %55, %cst_67 {dimension_numbers = #tpu.dot_dimension_numbers<[1], [0], [0], [1], [0, 0, 1, 1], [], []>} : vector<16x128xf32>, vector<128x128xf32>, vector<16x128xf32> -> vector<16x128xf32>
    %57 = arith.addf %52, %56 : vector<16x128xf32>
    %c2_68 = arith.constant 2 : index
    %c0_69 = arith.constant 0 : index
    %58 = vector.load %arg12[%c2_68, %c0_69] : memref<18x128xf32, #tpu.memory_space<vmem>>, vector<16x128xf32>
    %c2_70 = arith.constant 2 : index
    %c0_71 = arith.constant 0 : index
    %c0_72 = arith.constant 0 : index
    %59 = vector.load %arg6[%c2_70, %c0_71, %c0_72] : memref<3x128x128xf32, #tpu.memory_space<vmem>>, vector<1x128x128xf32>
    %60 = vector.shape_cast %59 : vector<1x128x128xf32> to vector<128x128xf32>
    %cst_73 = arith.constant dense<0.000000e+00> : vector<16x128xf32>
    %61 = tpu.matmul %58, %60, %cst_73 {dimension_numbers = #tpu.dot_dimension_numbers<[1], [0], [0], [1], [0, 0, 1, 1], [], []>} : vector<16x128xf32>, vector<128x128xf32>, vector<16x128xf32> -> vector<16x128xf32>
    %62 = arith.addf %57, %61 : vector<16x128xf32>
    %c0_74 = arith.constant 0 : index
    %c0_75 = arith.constant 0 : index
    %63 = vector.load %arg7[%c0_74, %c0_75] : memref<1x128xf32, #tpu.memory_space<vmem>>, vector<1x128xf32>
    %64 = vector.broadcast %63 : vector<1x128xf32> to vector<16x128xf32>
    %65 = arith.addf %62, %64 : vector<16x128xf32>
    %cst_76 = arith.constant 0.000000e+00 : f32
    %66 = vector.broadcast %cst_76 : f32 to vector<16x128xf32>
    %67 = arith.maximumf %65, %66 : vector<16x128xf32>
    %c0_77 = arith.constant 0 : index
    %c0_78 = arith.constant 0 : index
    %c0_79 = arith.constant 0 : index
    %68 = vector.load %arg1[%c0_77, %c0_78, %c0_79] : memref<1x16x64xf32, #tpu.memory_space<vmem>>, vector<1x16x64xf32>
    %69 = vector.shape_cast %68 : vector<1x16x64xf32> to vector<16x64xf32>
    %c0_80 = arith.constant 0 : index
    %c0_81 = arith.constant 0 : index
    %70 = vector.load %arg8[%c0_80, %c0_81] : memref<64x128xf32, #tpu.memory_space<vmem>>, vector<64x128xf32>
    %cst_82 = arith.constant dense<0.000000e+00> : vector<16x128xf32>
    %71 = tpu.matmul %69, %70, %cst_82 {dimension_numbers = #tpu.dot_dimension_numbers<[1], [0], [0], [1], [0, 0, 1, 1], [], []>} : vector<16x64xf32>, vector<64x128xf32>, vector<16x128xf32> -> vector<16x128xf32>
    %c0_83 = arith.constant 0 : index
    %c0_84 = arith.constant 0 : index
    %72 = vector.load %arg9[%c0_83, %c0_84] : memref<1x128xf32, #tpu.memory_space<vmem>>, vector<1x128xf32>
    %73 = vector.broadcast %72 : vector<1x128xf32> to vector<16x128xf32>
    %74 = arith.addf %71, %73 : vector<16x128xf32>
    %cst_85 = arith.constant 0.000000e+00 : f32
    %75 = vector.broadcast %cst_85 : f32 to vector<16x128xf32>
    %76 = arith.maximumf %74, %75 : vector<16x128xf32>
    %77 = arith.addf %67, %76 : vector<16x128xf32>
    %c0_86 = arith.constant 0 : index
    %c0_87 = arith.constant 0 : index
    %c0_88 = arith.constant 0 : index
    %78 = vector.load %arg10[%c0_86, %c0_87, %c0_88] : memref<1x16x128xf32, #tpu.memory_space<vmem>>, vector<1x16x128xf32>
    %79 = vector.shape_cast %78 : vector<1x16x128xf32> to vector<16x128xf32>
    %80 = vector.shape_cast %77 : vector<16x128xf32> to vector<1x16x128xf32>
    tpu.vector_store %arg10[%c0_86, %c0_87, %c0_88], %80 {strides = array<i32>} : memref<1x16x128xf32, #tpu.memory_space<vmem>>, vector<1x16x128xf32>,
    return
  }
  func.func @transform_0(%arg0: i32) -> (i32, i32, i32) {
    %c0_i32 = arith.constant 0 : i32
    %c0_i32_0 = arith.constant 0 : i32
    %c0_i32_1 = arith.constant 0 : i32
    return %arg0, %c0_i32, %c0_i32_0 : i32, i32, i32
  }
  func.func @transform_1(%arg0: i32) -> (i32, i32, i32) {
    %c0_i32 = arith.constant 0 : i32
    %c0_i32_0 = arith.constant 0 : i32
    %c0_i32_1 = arith.constant 0 : i32
    %c0_i32_2 = arith.constant 0 : i32
    return %c0_i32, %c0_i32_0, %c0_i32_1 : i32, i32, i32
  }
  func.func @transform_2(%arg0: i32) -> (i32, i32) {
    %c0_i32 = arith.constant 0 : i32
    %c0_i32_0 = arith.constant 0 : i32
    %c0_i32_1 = arith.constant 0 : i32
    return %c0_i32, %c0_i32_0 : i32, i32
  }
  func.func @transform_3(%arg0: i32) -> (i32, i32, i32) {
    %c0_i32 = arith.constant 0 : i32
    %c0_i32_0 = arith.constant 0 : i32
    %c0_i32_1 = arith.constant 0 : i32
    %c0_i32_2 = arith.constant 0 : i32
    return %c0_i32, %c0_i32_0, %c0_i32_1 : i32, i32, i32
  }
  func.func @transform_4(%arg0: i32) -> (i32, i32) {
    %c0_i32 = arith.constant 0 : i32
    %c0_i32_0 = arith.constant 0 : i32
    %c0_i32_1 = arith.constant 0 : i32
    return %c0_i32, %c0_i32_0 : i32, i32
  }
  func.func @transform_5(%arg0: i32) -> (i32, i32, i32) {
    %c0_i32 = arith.constant 0 : i32
    %c0_i32_0 = arith.constant 0 : i32
    %c0_i32_1 = arith.constant 0 : i32
    %c0_i32_2 = arith.constant 0 : i32
    return %c0_i32, %c0_i32_0, %c0_i32_1 : i32, i32, i32
  }
  func.func @transform_6(%arg0: i32) -> (i32, i32) {
    %c0_i32 = arith.constant 0 : i32
    %c0_i32_0 = arith.constant 0 : i32
    %c0_i32_1 = arith.constant 0 : i32
    return %c0_i32, %c0_i32_0 : i32, i32
  }
  func.func @transform_7(%arg0: i32) -> (i32, i32) {
    %c0_i32 = arith.constant 0 : i32
    %c0_i32_0 = arith.constant 0 : i32
    %c0_i32_1 = arith.constant 0 : i32
    return %c0_i32, %c0_i32_0 : i32, i32
  }
  func.func @transform_8(%arg0: i32) -> (i32, i32) {
    %c0_i32 = arith.constant 0 : i32
    %c0_i32_0 = arith.constant 0 : i32
    %c0_i32_1 = arith.constant 0 : i32
    return %c0_i32, %c0_i32_0 : i32, i32
  }
  func.func @transform_9(%arg0: i32) -> (i32, i32, i32) {
    %c0_i32 = arith.constant 0 : i32
    %c0_i32_0 = arith.constant 0 : i32
    %c0_i32_1 = arith.constant 0 : i32
    return %arg0, %c0_i32, %c0_i32_0 : i32, i32, i32
  }
}

</mosaic_0001>

<bundles_post_ra>
// kernel: tpu_custom_call.1
= control target key start
LH: loop header
LB: loop body
LE: loop exit
PB: predicated region body
PF: predicated region fallthrough
CT: control target
= control target key end

     0   :  { %s2963_s0 = inlined_call_operand.hbm [shape: f32[2,16,64], index: 0, kind: input, shape index: {}]   ;;  %s2964_s1 = inlined_call_operand.hbm [shape: f32[3,64,128], index: 1, kind: input, shape index: {}]   ;;  %s2965_s2 = inlined_call_operand.vmem [shape: f32[1,128], index: 2, kind: input, shape index: {}]   ;;  %s2966_s3 = inlined_call_operand.hbm [shape: f32[3,128,128], index: 3, kind: input, shape index: {}]   ;;  %s2967_s4 = inlined_call_operand.vmem [shape: f32[1,128], index: 4, kind: input, shape index: {}]   ;;  %s2968_s5 = inlined_call_operand.hbm [shape: f32[3,128,128], index: 5, kind: input, shape index: {}]   ;;  %s2969_s6 = inlined_call_operand.vmem [shape: f32[1,128], index: 6, kind: input, shape index: {}]   ;;  %s2970_s7 = inlined_call_operand.hbm [shape: f32[64,128], index: 7, kind: input, shape index: {}]   ;;  %s2971_s8 = inlined_call_operand.vmem [shape: f32[1,128], index: 8, kind: input, shape index: {}]   ;;  %s2972_s9 = inlined_call_operand.hbm [shape: f32[2,16,128], index: 9, kind: output, shape index: {}]  }
   0x1   :  { %2979 = sst [smem:[#allocation20_spill]] %s2972_s9 }
   0x2   :  { %14 = vsyncpa [#allocation5], 0 }
   0x3   :  { %16 = vsyncpa [#allocation5 + $0x1], 0 }
   0x4   :  { %17 = vsyncpa [#allocation8], 0 }
   0x5   :  { %18 = vsyncpa [#allocation11], 0 }
   0x6   :  { %19 = vsyncpa [#allocation6], 0 }
   0x7   :  { %21 = vsyncpa [#allocation6 + $0x1], 0  ;;  %s2637_s30 = smov 0   ;;  %s2639_s10 = smov 0  }
   0x8   :  { %s2641_s11 = smov 0   ;;  %s2643_s12 = smov 0  }
   0x9 LB: > { %2980 = sst [smem:[#allocation18_spill]] %s2562_s30  ;;  %s2658_s13 = sadd.s32 4294967295, %s2574_s12   ;;  %s2574_s12 = sphi %s2643_s12, %s3004_s12   ;;  %s2570_s11 = sphi %s2641_s11, %s3003_s11   ;;  %s2566_s10 = sphi %s2639_s10, %s3002_s10   ;;  %s2562_s30 = sphi %s2637_s30, %s3001_s30  }
   0xa   : > { %s1528_s14 = sadd.s32 4294967294, %s2574_s12   ;;  %p47_p0 = scmp.ne.s32.totalorder %s2566_s10, %s2562_s30 }
   0xb   : > { %p2973_p1 = scmp.eq.s32.totalorder %s2658_s13, 0  ;;  %p245_p3 = scmp.eq.s32.totalorder %s1528_s14, 1 }
   0xc   : > { %p1529_p5 = scmp.ge.s32.totalorder %s2574_s12, 1  ;;  %p252_p7 = scmp.lt.s32.totalorder %s2574_s12, 3 }
   0xd   : > { %p2667_p4 = por %p2973_p1, %p47_p0  ;;  %p2672_p6 = por %p245_p3, %p47_p0 }
   0xe   : > { %p2677_p8 = pnand %p1529_p5, %p252_p7  ;;  %s2576_s18 = smov [#allocation7]  }
   0xf   : > { %s2981_s15 = scalar_select %p2667_p4, 1, 0 }
  0x10   : > { %s2982_s16 = scalar_select %p2672_p6, 1, 0 }
  0x11   : > { %s2984_s17 = scalar_select %p2677_p8, 1, 0 }
  0x12   : > { %2983 = sst [smem:[#allocation19_spill]] %s2982_s16  ;;  %s264_s19 = sshll.u32 %s2576_s18, 4  ;;  %s2681_s19 = int_to_ptr.vmem [resolvable:$true] %s264_s19 }
  0x13   : > { %p2286_p9 = pneg %p2677_p8  ;;  %s2577_s21 = smov [#allocation10]  }
  0x14   : > { %s296_s22 = sshll.u32 %s2577_s21, 4  ;;  %s2578_s23 = smov [#allocation9]   ;;  %s2692_s22 = int_to_ptr.vmem [resolvable:$true] %s296_s22 }
  0x15   : > { %p2688_p11 = pnand %p2286_p9, %p2973_p1  ;;  %s2694_s24 = sshll.u32 %s2578_s23, 4  ;;  %s281_s24 = int_to_ptr.vmem [resolvable:$true] %s2694_s24 }
  0x16   : > { %s2358_s27 = scalar_lea.hbm %s2964_s1, 3072 }
  0x17   : > { %p2359_p12 = scmp.ne.s32.totalorder %s2964_s1, %s2358_s27  ;;  %p2704_p13 = pneg %p2688_p11 }
  0x18   : > { %p2365_p5 = scmp.lt.u32.totalorder %s2358_s27, %s2964_s1 }
  0x19   : > { %p2361_p0 = pnand %p2704_p13, %p2359_p12 }
  0x1b   : > { %p2362_p3 = pneg %p2361_p0 }
  0x1d   : > { %p2367_p7 = pnand %p2365_p5, %p2362_p3 }
  0x1f   : > { %2370 = shalt.err (!%p2367_p7)
}
  0x20   : > { %s2371_s23 = scalar_lea.vmem %s2681_s19, 3072  ;;  %p2379_p2 = scmp.lt.s32.totalorder %s2681_s19, %s2681_s19 }
  0x21   : > { %p2372_p9 = scmp.ne.s32.totalorder %s2681_s19, %s2371_s23  ;;  %p2380_p6 = scmp.lt.s32.totalorder %s2371_s23, %s2371_s23 }
  0x23   : > { %p2374_p10 = pnand %p2372_p9, %p2704_p13  ;;  %p2381_p12 = por %p2380_p6, %p2379_p2 }
  0x25   : > { %p2375_p1 = pneg %p2374_p10 }
  0x27   : > { %p2382_p0 = pnand %p2381_p12, %p2375_p1 }
  0x29   : > { %2385 = shalt.err (!%p2382_p0)
}
  0x2a   : > { %s2579_s25 = smov 128   ;;  %s2580_s26 = smov 8  }
  0x2b   : > { %2289 = dma.hbm_to_vmem [thread:$0]  (!%p2688_p11), %s2964_s1, 3072, %s2681_s19, [#allocation8], %s2579_s25, %s2579_s25, %s2580_s26  }
  0x2c   : > { %s2386_s21 = scalar_lea.hbm %s2968_s5, 6144 }
  0x2d   : > { %p2387_p1 = scmp.ne.s32.totalorder %s2968_s5, %s2386_s21  ;;  %p2393_p10 = scmp.lt.u32.totalorder %s2386_s21, %s2968_s5 }
  0x2f   : > { %p2389_p2 = pnand %p2387_p1, %p2704_p13 }
  0x31   : > { %p2390_p6 = pneg %p2389_p2 }
  0x33   : > { %p2395_p3 = pnand %p2393_p10, %p2390_p6 }
  0x35   : > { %2398 = shalt.err (!%p2395_p3)
}
  0x36   : > { %s2399_s19 = scalar_lea.vmem %s2692_s22, 6144  ;;  %p2407_p12 = scmp.lt.s32.totalorder %s2692_s22, %s2692_s22 }
  0x37   : > { %p2400_p5 = scmp.ne.s32.totalorder %s2692_s22, %s2399_s19  ;;  %p2408_p0 = scmp.lt.s32.totalorder %s2399_s19, %s2399_s19 }
  0x39   : > { %p2402_p7 = pnand %p2400_p5, %p2704_p13  ;;  %p2409_p1 = por %p2408_p0, %p2407_p12 }
  0x3b   : > { %p2403_p9 = pneg %p2402_p7 }
  0x3d   : > { %p2410_p2 = pnand %p2409_p1, %p2403_p9 }
  0x3f   : > { %2413 = shalt.err (!%p2410_p2)
}
  0x40   : > { %2295 = dma.hbm_to_vmem [thread:$0]  (!%p2688_p11), %s2968_s5, 6144, %s2692_s22, [#allocation11], %s2579_s25, %s2579_s25, %s2580_s26  }
  0x41   : > { %s2414_s28 = scalar_lea.hbm %s2966_s3, 6144 }
  0x42   : > { %p2415_p6 = scmp.ne.s32.totalorder %s2966_s3, %s2414_s28  ;;  %p2421_p5 = scmp.lt.u32.totalorder %s2414_s28, %s2966_s3 }
  0x44   : > { %p2417_p10 = pnand %p2415_p6, %p2704_p13 }
  0x46   : > { %p2418_p3 = pneg %p2417_p10 }
  0x48   : > { %p2423_p7 = pnand %p2421_p5, %p2418_p3 }
  0x4a   : > { %2426 = shalt.err (!%p2423_p7)
}
  0x4b   : > { %s2427_s19 = scalar_lea.vmem %s281_s24, 6144  ;;  %p2435_p1 = scmp.lt.s32.totalorder %s281_s24, %s281_s24 }
  0x4c   : > { %p2428_p9 = scmp.ne.s32.totalorder %s281_s24, %s2427_s19  ;;  %p2436_p2 = scmp.lt.s32.totalorder %s2427_s19, %s2427_s19 }
  0x4e   : > { %p2430_p12 = pnand %p2428_p9, %p2704_p13  ;;  %p2437_p4 = por %p2436_p2, %p2435_p1 }
  0x50   : > { %p2431_p0 = pneg %p2430_p12 }
  0x52   : > { %p2438_p8 = pnand %p2437_p4, %p2431_p0 }
  0x54   : > { %2441 = shalt.err (!%p2438_p8)
}
  0x55   : > { %2292 = dma.hbm_to_vmem [thread:$0]  (!%p2688_p11), %s2966_s3, 6144, %s281_s24, [#allocation8], %s2579_s25, %s2579_s25, %s2580_s26  }
  0x56   : > { %s2581_s30 = smov [#allocation12]   ;;  %s2442_s29 = scalar_lea.hbm %s2970_s7, 1024 }
  0x57   : > { %s312_s16 = sshll.u32 %s2581_s30, 4  ;;  %p2443_p4 = scmp.ne.s32.totalorder %s2970_s7, %s2442_s29  ;;  %s313_s16 = int_to_ptr.vmem [resolvable:$true] %s312_s16 }
  0x58   : > { %p2449_p10 = scmp.lt.u32.totalorder %s2442_s29, %s2970_s7 }
  0x59   : > { %p2445_p8 = pnand %p2443_p4, %p2704_p13 }
  0x5b   : > { %p2446_p6 = pneg %p2445_p8 }
  0x5d   : > { %p2451_p3 = pnand %p2449_p10, %p2446_p6 }
  0x5f   : > { %2454 = shalt.err (!%p2451_p3)
}
  0x60   : > { %s2455_s24 = scalar_lea.vmem %s313_s16, 1024  ;;  %p2463_p12 = scmp.lt.s32.totalorder %s313_s16, %s313_s16 }
  0x61   : > { %p2456_p5 = scmp.ne.s32.totalorder %s313_s16, %s2455_s24  ;;  %p2464_p0 = scmp.lt.s32.totalorder %s2455_s24, %s2455_s24 }
  0x63   : > { %p2458_p7 = pnand %p2456_p5, %p2704_p13  ;;  %p2465_p1 = por %p2464_p0, %p2463_p12 }
  0x65   : > { %p2459_p9 = pneg %p2458_p7 }
  0x67   : > { %p2466_p2 = pnand %p2465_p1, %p2459_p9 }
  0x69   : > { %2469 = shalt.err (!%p2466_p2)
}
  0x6a   : > { %2298 = dma.hbm_to_vmem [thread:$0]  (!%p2688_p11), %s2970_s7, 1024, %s313_s16, [#allocation11], %s2579_s25, %s2579_s25, %s2580_s26  }
  0x6b   : > { %s2798_s14 = sadd.s32 1, %s2574_s12   ;;  %s34_s20 = sadd.s32 1, %s2570_s11 }
  0x6c   : > { %s31_s30 = ssub.s32 %s2574_s12, %s2798_s14  ;;  %p41_p13 = scmp.ne.s32.totalorder %s2570_s11, %s2566_s10 }
  0x6d   : > { %p32_p4 = scmp.eq.s32.totalorder %s31_s30, 0  ;;  %p42_p8 = scmp.eq.s32.totalorder %s2574_s12, 0 }
  0x6e   : > { %p2987_p6 = scmp.eq.s32.totalorder %s2658_s13, 1  ;;  %p2311_p3 = scmp.lt.s32.totalorder %s2574_s12, 2 }
  0x6f   : > { %s2814_s28 = scalar_select %p32_p4, %s2570_s11, %s34_s20  }
  0x70   : > { %p2808_p10 = por %p2987_p6, %p41_p13  ;;  %p43_p5 = por %p42_p8, %p41_p13 }
  0x71   : > { %s329_s29 = sand.u32 1, %s2570_s11   ;;  %s1562_s16 = sshll.u32 %s2574_s12, 8 }
  0x72   : > { %s1535_s18 = sshll.u32 %s329_s29, 4  ;;  %s2821_s19 = scalar_lea.hbm %s2963_s0, %s1562_s16 }
  0x73   : > { %s333_s24 = scalar_lea.vmem [#allocation4], %s1535_s18  ;;  %p2825_p11 = pnand %p2311_p3, %p43_p5 }
  0x74   : > { %s340_s22 = sshll.u32 %s333_s24, 4  ;;  %s2829_s20 = scalar_lea.sflag [#allocation5], %s329_s29  ;;  %s2823_s22 = int_to_ptr.vmem [resolvable:$true] %s340_s22 }
  0x75   : > { %s2470_s30 = scalar_lea.hbm %s2821_s19, 256  ;;  %p2472_p9 = pneg %p2825_p11 }
  0x76   : > { %p2471_p7 = scmp.ne.s32.totalorder %s2821_s19, %s2470_s30  ;;  %s2475_s21 = scalar_lea.hbm %s2963_s0, 512 }
  0x77   : > { %p2476_p1 = scmp.lt.u32.totalorder %s2821_s19, %s2963_s0  ;;  %p2477_p2 = scmp.lt.u32.totalorder %s2475_s21, %s2470_s30 }
  0x78   : > { %p2473_p12 = pnand %p2472_p9, %p2471_p7  ;;  %p2479_p4 = scmp.lt.u32.totalorder %s2470_s30, %s2821_s19 }
  0x79   : > { %p2478_p13 = por %p2477_p2, %p2476_p1 }
  0x7a   : > { %p2474_p0 = pneg %p2473_p12 }
  0x7b   : > { %p2480_p8 = por %p2479_p4, %p2478_p13 }
  0x7d   : > { %p2481_p6 = pnand %p2480_p8, %p2474_p0 }
  0x7f   : > { %2484 = shalt.err (!%p2481_p6)
}
  0x80   : > { %s2485_s29 = scalar_lea.vmem %s2823_s22, 256  ;;  %s2582_s18 = smov [#allocation4]  }
  0x81   : > { %p2486_p3 = scmp.ne.s32.totalorder %s2823_s22, %s2485_s29  ;;  %s2490_s16 = sshll.u32 %s2582_s18, 4  ;;  %s2491_s16 = int_to_ptr.vmem [resolvable:$false] %s2490_s16 }
  0x82   : > { %s2492_s23 = scalar_lea.vmem %s2491_s16, 512  ;;  %p2493_p12 = scmp.lt.s32.totalorder %s2823_s22, %s2491_s16 }
  0x83   : > { %p2488_p5 = pnand %p2486_p3, %p2472_p9  ;;  %p2494_p1 = scmp.lt.s32.totalorder %s2492_s23, %s2485_s29 }
  0x85   : > { %p2489_p7 = pneg %p2488_p5  ;;  %p2495_p2 = por %p2494_p1, %p2493_p12 }
  0x87   : > { %p2496_p13 = pnand %p2495_p2, %p2489_p7 }
  0x89   : > { %2499 = shalt.err (!%p2496_p13)
}
  0x8a   : > { %2302 = dma.hbm_to_vmem [thread:$0]  (!%p2825_p11), %s2821_s19, 256, %s2823_s22, %s2829_s20, %s2579_s25, %s2579_s25, %s2580_s26  }
  0x8b   : > { %p2990_p9 = scmp.ne.s32.totalorder %s2984_s17, 0 }
  0x8c   : > { %s2863_s30 = sand.u32 (!%p2990_p9), 1, %s2566_s10   ;;  %p2991_p0 = scmp.ne.s32.totalorder (!%p2990_p9), %s2981_s15, 0 }
  0x8d   : > { %352 = sbr.rel (%p2990_p9) target bundleno = 991 (0x3df), region = 56  ;;  %s1539_s21 = sshll.u32 (!%p2990_p9), %s2863_s30, 4 }
  0x8e   : > { %s355_s24 = scalar_lea.sflag (!%p2990_p9), [#allocation5], %s2863_s30  ;;  %s358_s9 = scalar_lea.vmem (!%p2990_p9), [#allocation4], %s1539_s21 }
  0x94   : > { %2545 = dma.done.wait (%p2991_p0), %s355_s24, 256  }
  0x95   : > { %2547 = vsyncadd (%p2991_p0), %s355_s24, 4294967040  ;;  %p2992_p11 = scmp.eq.s32.totalorder %s2658_s13, 0 }
  0x97   : > { %2549 = dma.done.wait (%p2992_p11), [#allocation8], 9216   ;;  %p2993_p4 = pmov %p2992_p11 }
  0x99   : > { %2551 = vsyncadd (%p2993_p4), [#allocation8], 4294958080  ;;  %p2994_p8 = pmov %p2993_p4 }
  0x9a   : > { %p2995_p6 = pmov %p2993_p4 }
  0x9b   : > { %2553 = dma.done.wait (%p2994_p8), [#allocation11], 7168  }
  0x9c   : > { %2555 = vsyncadd (%p2995_p6), [#allocation11], 4294960128  ;;  %vm409_vm0 = vcmask 516096   ;;  %v2583_v0 = vmov 0.0   ;;  %v419_v1 = vld [vmem:[#allocation7] sm:$0xff]  ;;  %v420_v2 = vld [vmem:[#allocation7 + $0x8] sm:$0xff] }
  0x9d   : > { %410 = vst.msk [vmem:[#allocation2] sm:$0x1] %vm409_vm0, %v2583_v0  ;;  %411 = vst.msk [vmem:[#allocation2 + $0x11] sm:$0x1] %vm409_vm0, %v2583_v0  ;;  %v421_v3 = vld [vmem:[#allocation7 + $0x10] sm:$0xff]  ;;  %v2014_v4 = vpack.c.bf16 %v420_v2, %v419_v1  ;;  %v422_v5 = vld [vmem:[#allocation7 + $0x18] sm:$0xff] }
  0x9e   : > { %705 = vst [vmem:[#allocation3] sm:$0x1] %v2583_v0  ;;  %706 = vst [vmem:[#allocation3 + $0x11] sm:$0x1] %v2583_v0  ;;  %vm414_vm1 = vcmask 523264   ;;  %v2018_v6 = vpack.c.bf16 %v422_v5, %v421_v3  ;;  %v423_v7 = vld [vmem:[#allocation7 + $0x20] sm:$0xff] }
  0x9f   : > { %v424_v8 = vld [vmem:[#allocation7 + $0x28] sm:$0xff]  ;;  %v430_v9 = vld [vmem:[#allocation7 + $0x40] sm:$0xff]  ;;  %2015 = vmatprep.subr.bf16.mxu0 %v2014_v4  ;;  %v432_v14 = vld [vmem:[#allocation7 + $0x50] sm:$0xff]  ;;  %s408_s18 = scalar_lea.vmem [#allocation13], %s1539_s21  ;;  %s1563_s23 = sshll.u32 %s2658_s13, 8 }
  0xa0   : > { %v431_v10 = vld [vmem:[#allocation7 + $0x48] sm:$0xff]  ;;  %v2881_v11 = vld [vmem:[%s358_s9] sm:$0xff]  ;;  %2017 = vmatpush3.bf16.msra.mxu0 %v2014_v4  ;;  %v2022_v15 = vpack.c.bf16 %v424_v8, %v423_v7  ;;  %v433_v17 = vld [vmem:[#allocation7 + $0x58] sm:$0xff]  ;;  %s1417_s16 = sshll.u32 %s408_s18, 4  ;;  %s2996_s15 = sld [smem:[#allocation20_spill]]  ;;  %s2914_s16 = int_to_ptr.vmem [resolvable:$true] %s1417_s16 }
  0xa1   : > { %v1998_v12 = vpack.c.bf16 %v431_v10, %v430_v9  ;;  %415 = vst.msk [vmem:[#allocation2 + $0x1] sm:$0xff] %vm414_vm1, %v2881_v11  ;;  %v2885_v13 = vld [vmem:[%s358_s9 + $0x8] sm:$0xff]  ;;  %2019 = vmatprep.subr.bf16.mxu0 %v2018_v6  ;;  %v425_v16 = vld [vmem:[#allocation7 + $0x30] sm:$0xff]  ;;  %v2002_v19 = vpack.c.bf16 %v433_v17, %v432_v14  ;;  %v434_v20 = vld [vmem:[#allocation7 + $0x60] sm:$0xff]  ;;  %s1404_s21 = scalar_lea.sflag [#allocation6], %s2863_s30  ;;  %s2500_s25 = scalar_lea.vmem %s2914_s16, 256 }
  0xa2   : > { %416 = vst.msk [vmem:[#allocation2 + $0x9] sm:$0xff] %vm414_vm1, %v2885_v13  ;;  %v426_v18 = vld [vmem:[#allocation7 + $0x38] sm:$0xff]  ;;  %v435_v21 = vld [vmem:[#allocation7 + $0x68] sm:$0xff]  ;;  %v436_v24 = vld [vmem:[#allocation7 + $0x70] sm:$0xff]  ;;  %p2501_p3 = scmp.ne.s32.totalorder %s2914_s16, %s2500_s25  ;;  %s2584_s13 = smov [#allocation13]  }
  0xa3   : > { %1999 = vmatprep.subr.bf16.mxu1 %v1998_v12  ;;  %v2026_v22 = vpack.c.bf16 %v426_v18, %v425_v16  ;;  %v2006_v23 = vpack.c.bf16 %v435_v21, %v434_v20  ;;  %v437_v25 = vld [vmem:[#allocation7 + $0x78] sm:$0xff]  ;;  %v603_v26 = vld [vmem:[#allocation7 + $0x80] sm:$0xff]  ;;  %v604_v27 = vld [vmem:[#allocation7 + $0x88] sm:$0xff]  ;;  %s2504_s26 = sshll.u32 %s2584_s13, 4  ;;  %s2505_s26 = int_to_ptr.vmem [resolvable:$false] %s2504_s26 }
  0xa4   : > { %2001 = vmatpush3.bf16.msra.mxu1 %v1998_v12  ;;  %2021 = vmatpush3.bf16.msra.mxu0 %v2018_v6  ;;  %v2010_v30 = vpack.c.bf16 %v437_v25, %v436_v24  ;;  %v2030_v31 = vpack.c.bf16 %v604_v27, %v603_v26  ;;  %v605_v32 = vld [vmem:[#allocation7 + $0x90] sm:$0xff]  ;;  %v606_v33 = vld [vmem:[#allocation7 + $0x98] sm:$0xff]  ;;  %v730_v34 = vld [vmem:[#allocation9 + $0x80] sm:$0xff]  ;;  %p2502_p5 = pnand %p2501_p3, %p2808_p10  ;;  %s2506_s19 = scalar_lea.vmem %s2505_s26, 512 }
  0xa5   : > { %2003 = vmatprep.subr.bf16.mxu1 %v2002_v19  ;;  %2023 = vmatprep.subr.bf16.mxu0 %v2022_v15  ;;  %v731_v35 = vld [vmem:[#allocation9 + $0x88] sm:$0xff]  ;;  %v2034_v37 = vpack.c.bf16 %v606_v33, %v605_v32  ;;  %v732_v40 = vld [vmem:[#allocation9 + $0x90] sm:$0xff]  ;;  %v733_v41 = vld [vmem:[#allocation9 + $0x98] sm:$0xff]  ;;  %p2507_p12 = scmp.lt.s32.totalorder %s2914_s16, %s2505_s26  ;;  %p2508_p1 = scmp.lt.s32.totalorder %s2506_s19, %s2500_s25 }
  0xa6   : > { %v2046_v39 = vpack.c.bf16 %v731_v35, %v730_v34  ;;  %v607_v42 = vld [vmem:[#allocation7 + $0xa0] sm:$0xff]  ;;  %v608_v43 = vld [vmem:[#allocation7 + $0xa8] sm:$0xff]  ;;  %v2050_v45 = vpack.c.bf16 %v733_v41, %v732_v40  ;;  %v609_v49 = vld [vmem:[#allocation7 + $0xb0] sm:$0xff]  ;;  %s2919_s17 = scalar_lea.hbm %s2996_s15, %s1563_s23  ;;  %p2503_p7 = pneg %p2502_p5 }
  0xa7   : > { %v2038_v46 = vpack.c.bf16 %v608_v43, %v607_v42  ;;  %v734_v47 = vld [vmem:[#allocation9 + $0xa0] sm:$0xff]  ;;  %v735_v48 = vld [vmem:[#allocation9 + $0xa8] sm:$0xff]  ;;  %v610_v50 = vld [vmem:[#allocation7 + $0xb8] sm:$0xff]  ;;  %p2509_p2 = por %p2508_p1, %p2507_p12 }
  0xa8   : > { %v417_v28 = vld [vmem:[#allocation2] sm:$0xff]  ;;  %2005 = vmatpush3.bf16.msra.mxu1 %v2002_v19  ;;  %2025 = vmatpush3.bf16.msra.mxu0 %v2022_v15  ;;  %v2054_v51 = vpack.c.bf16 %v735_v48, %v734_v47  ;;  %v2042_v52 = vpack.c.bf16 %v610_v50, %v609_v49  ;;  %v737_v54 = vld [vmem:[#allocation9 + $0xb8] sm:$0xff]  ;;  %v738_v57 = vld [vmem:[#allocation9 + $0xc0] sm:$0xff] }
  0xa9   : > { %v427_v29 = vld [vmem:[#allocation2 + $0x1] sm:$0xff]  ;;  %1747 = vmatprep.mubr.msk.f32.mxu0 %vm414_vm1, %v417_v28  ;;  %2027 = vmatprep.subr.bf16.mxu0 %v2026_v22  ;;  %v428_v44 = vld [vmem:[#allocation2 + $0x9] sm:$0xff]  ;;  %v739_v58 = vld [vmem:[#allocation9 + $0xc8] sm:$0xff]  ;;  %p2510_p13 = pnand %p2509_p2, %p2503_p7 }
  0xaa   : > { %2007 = vmatprep.subr.bf16.mxu1 %v2006_v23  ;;  %1728 = vmatprep.mubr.msk.f32.mxu1 %vm414_vm1, %v427_v29  ;;  %v418_v36 = vld [vmem:[#allocation2 + $0x8] sm:$0xff]  ;;  %v736_v53 = vld [vmem:[#allocation9 + $0xb0] sm:$0xff]  ;;  %v2062_v59 = vpack.c.bf16 %v739_v58, %v738_v57  ;;  %v742_v63 = vld [vmem:[#allocation9 + $0xe0] sm:$0xff] }
  0xab   : > { %v600_v38 = vld [vmem:[#allocation2 + $0x2] sm:$0xff]  ;;  %v2058_v55 = vpack.c.bf16 %v737_v54, %v736_v53  ;;  %v601_v56 = vld [vmem:[#allocation2 + $0xa] sm:$0xff]  ;;  %v743_v0 = vld [vmem:[#allocation9 + $0xe8] sm:$0xff] }
  0xac   : > { %2009 = vmatpush3.bf16.msra.mxu1 %v2006_v23  ;;  %2029 = vmatpush3.bf16.msra.mxu0 %v2026_v22  ;;  %v740_v60 = vld [vmem:[#allocation9 + $0xd0] sm:$0xff]  ;;  %v741_v61 = vld [vmem:[#allocation9 + $0xd8] sm:$0xff]  ;;  %v2070_v1 = vpack.c.bf16 %v743_v0, %v742_v63  ;;  %v711_v5 = vld [vmem:[#allocation9] sm:$0xff] }
  0xad   : > { %2011 = vmatprep.subr.bf16.mxu1 %v2010_v30  ;;  %2031 = vmatprep.subr.bf16.mxu0 %v2030_v31  ;;  %v2066_v62 = vpack.c.bf16 %v741_v61, %v740_v60  ;;  %v744_v2 = vld [vmem:[#allocation9 + $0xf0] sm:$0xff]  ;;  %v745_v3 = vld [vmem:[#allocation9 + $0xf8] sm:$0xff]  ;;  %v712_v6 = vld [vmem:[#allocation9 + $0x8] sm:$0xff] }
  0xae   : > { %v2074_v4 = vpack.c.bf16 %v745_v3, %v744_v2  ;;  %v2078_v7 = vpack.c.bf16 %v712_v6, %v711_v5  ;;  %v1026_v8 = vld [vmem:[#allocation10 + $0x80] sm:$0xff]  ;;  %v1027_v9 = vld [vmem:[#allocation10 + $0x88] sm:$0xff]  ;;  %v1028_v10 = vld [vmem:[#allocation10 + $0x90] sm:$0xff] }
  0xaf   : > { %1748 = vmatmul.mubr.msk.f32.vlgmr.msra.gmra.mrb[0].mxu0 %vm414_vm1, %v418_v36  ;;  %v2142_v12 = vpack.c.bf16 %v1027_v9, %v1026_v8  ;;  %v1029_v14 = vld [vmem:[#allocation10 + $0x98] sm:$0xff]  ;;  %v1030_v16 = vld [vmem:[#allocation10 + $0xa0] sm:$0xff]  ;;  %v1031_v17 = vld [vmem:[#allocation10 + $0xa8] sm:$0xff] }
  0xb0   : > { %2013 = vmatpush3.bf16.msra.mxu1 %v2010_v30  ;;  %2033 = vmatpush3.bf16.msra.mxu0 %v2030_v31  ;;  %v2146_v15 = vpack.c.bf16 %v1029_v14, %v1028_v10  ;;  %v2150_v18 = vpack.c.bf16 %v1031_v17, %v1030_v16  ;;  %v1032_v19 = vld [vmem:[#allocation10 + $0xb0] sm:$0xff]  ;;  %v1033_v20 = vld [vmem:[#allocation10 + $0xb8] sm:$0xff]  ;;  %v1034_v22 = vld [vmem:[#allocation10 + $0xc0] sm:$0xff] }
  0xb1   : > { %1766 = vmatprep.mubr.msk.f32.mxu0 %vm414_vm1, %v600_v38  ;;  %2035 = vmatprep.subr.bf16.mxu0 %v2034_v37  ;;  %v2154_v21 = vpack.c.bf16 %v1033_v20, %v1032_v19  ;;  %v1035_v23 = vld [vmem:[#allocation10 + $0xc8] sm:$0xff]  ;;  %v1551_v28 = vld [vmem:[%s2965_s2] ss:$0 sm:$0xff]  ;;  %v714_v35 = vld [vmem:[#allocation9 + $0x18] sm:$0xff] }
  0xb2   : > { %2047 = vmatprep.subr.bf16.mxu1 %v2046_v39  ;;  %v2158_v24 = vpack.c.bf16 %v1035_v23, %v1034_v22  ;;  %v713_v34 = vld [vmem:[#allocation9 + $0x10] sm:$0xff]  ;;  %v716_v40 = vld [vmem:[#allocation9 + $0x28] sm:$0xff]  ;;  %v718_v43 = vld [vmem:[#allocation9 + $0x38] sm:$0xff] }
  0xb3   : > { %1729 = vmatmul.mubr.msk.f32.vlgmr.msra.gmra.mrb[0].mxu1 %vm414_vm1, %v428_v44  ;;  %v2082_v38 = vpack.c.bf16 %v714_v35, %v713_v34  ;;  %v717_v42 = vld [vmem:[#allocation9 + $0x30] sm:$0xff]  ;;  %v720_v47 = vld [vmem:[#allocation9 + $0x48] sm:$0xff]  ;;  %v722_v50 = vld [vmem:[#allocation9 + $0x58] sm:$0xff] }
  0xb4   : > { %2049 = vmatpush3.bf16.msra.mxu1 %v2046_v39  ;;  %2037 = vmatpush3.bf16.msra.mxu0 %v2034_v37  ;;  %v715_v39 = vld [vmem:[#allocation9 + $0x20] sm:$0xff]  ;;  %v721_v49 = vld [vmem:[#allocation9 + $0x50] sm:$0xff]  ;;  %v724_v53 = vld [vmem:[#allocation9 + $0x68] sm:$0xff] }
  0xb5   : > { %2051 = vmatprep.subr.bf16.mxu1 %v2050_v45  ;;  %2039 = vmatprep.subr.bf16.mxu0 %v2038_v46  ;;  %v2086_v41 = vpack.c.bf16 %v716_v40, %v715_v39  ;;  %v899_v58 = vld [vmem:[#allocation9 + $0x100] sm:$0xff]  ;;  %v901_v61 = vld [vmem:[#allocation9 + $0x110] sm:$0xff]  ;;  %v904_v2 = vld [vmem:[#allocation9 + $0x128] sm:$0xff] }
  0xb6   : > { %v905_v5 = vld [vmem:[#allocation9 + $0x130] sm:$0xff]  ;;  %v906_v6 = vld [vmem:[#allocation9 + $0x138] sm:$0xff]  ;;  %v907_v8 = vld [vmem:[#allocation9 + $0x140] sm:$0xff] }
  0xb7   : > { %v908_v9 = vld [vmem:[#allocation9 + $0x148] sm:$0xff]  ;;  %v910_v14 = vld [vmem:[#allocation9 + $0x158] sm:$0xff]  ;;  %v911_v16 = vld [vmem:[#allocation9 + $0x160] sm:$0xff] }
  0xb8   : > { %2053 = vmatpush3.bf16.msra.mxu1 %v2050_v45  ;;  %2041 = vmatpush3.bf16.msra.mxu0 %v2038_v46  ;;  %v2090_v45 = vpack.c.bf16 %v718_v43, %v717_v42  ;;  %v719_v46 = vld [vmem:[#allocation9 + $0x40] sm:$0xff]  ;;  %v2126_v10 = vpack.c.bf16 %v908_v9, %v907_v8  ;;  %v912_v17 = vld [vmem:[#allocation9 + $0x168] sm:$0xff]  ;;  %v913_v19 = vld [vmem:[#allocation9 + $0x170] sm:$0xff] }
  0xb9   : > { %2055 = vmatprep.subr.bf16.mxu1 %v2054_v51  ;;  %2043 = vmatprep.subr.bf16.mxu0 %v2042_v52  ;;  %v2094_v48 = vpack.c.bf16 %v720_v47, %v719_v46  ;;  %v914_v20 = vld [vmem:[#allocation9 + $0x178] sm:$0xff]  ;;  %v1036_v23 = vld [vmem:[#allocation10 + $0xd0] sm:$0xff]  ;;  %v1302_v35 = vld [vmem:[#allocation12 + $0x8] sm:$0xff] }
  0xba   : > { %v1305_v40 = vld [vmem:[#allocation12 + $0x20] sm:$0xff]  ;;  %v1307_v43 = vld [vmem:[#allocation12 + $0x30] sm:$0xff]  ;;  %v1022_v8 = vld [vmem:[#allocation10 + $0x78] sm:$0xff] }
  0xbb   : > { %v1552_v46 = vld [vmem:[%s2967_s4] ss:$0 sm:$0xff] }
  0xbc   : > { %2057 = vmatpush3.bf16.msra.mxu1 %v2054_v51  ;;  %2045 = vmatpush3.bf16.msra.mxu0 %v2042_v52  ;;  %v2098_v51 = vpack.c.bf16 %v722_v50, %v721_v49  ;;  %v723_v52 = vld [vmem:[#allocation9 + $0x60] sm:$0xff] }
  0xbd   : > { %2059 = vmatprep.subr.bf16.mxu1 %v2058_v55  ;;  %2143 = vmatprep.subr.bf16.mxu0 %v2142_v12  ;;  %v2102_v54 = vpack.c.bf16 %v724_v53, %v723_v52  ;;  %v1010_v52 = vld [vmem:[#allocation10 + $0x18] sm:$0xff] }
  0xbf   : > { %1767 = vmatmul.mubr.msk.f32.vlgmr.msra.gmra.mrb[0].mxu0 %vm414_vm1, %v601_v56  ;;  %v726_v56 = vld [vmem:[#allocation9 + $0x78] sm:$0xff] }
  0xc0   : > { %2061 = vmatpush3.bf16.msra.mxu1 %v2058_v55  ;;  %2145 = vmatpush3.bf16.msra.mxu0 %v2142_v12  ;;  %v725_v55 = vld [vmem:[#allocation9 + $0x70] sm:$0xff] }
  0xc1   : > { %2063 = vmatprep.subr.bf16.mxu1 %v2062_v59  ;;  %2147 = vmatprep.subr.bf16.mxu0 %v2146_v15  ;;  %v2106_v57 = vpack.c.bf16 %v726_v56, %v725_v55  ;;  %v909_v12 = vld [vmem:[#allocation9 + $0x150] sm:$0xff]  ;;  %v1011_v56 = vld [vmem:[#allocation10 + $0x20] sm:$0xff] }
  0xc4   : > { %2065 = vmatpush3.bf16.msra.mxu1 %v2062_v59  ;;  %2149 = vmatpush3.bf16.msra.mxu0 %v2146_v15  ;;  %v900_v59 = vld [vmem:[#allocation9 + $0x108] sm:$0xff]  ;;  %v2130_v15 = vpack.c.bf16 %v910_v14, %v909_v12 }
  0xc5   : > { %2067 = vmatprep.subr.bf16.mxu1 %v2066_v62  ;;  %2151 = vmatprep.subr.bf16.mxu0 %v2150_v18  ;;  %v2110_v60 = vpack.c.bf16 %v900_v59, %v899_v58  ;;  %v1013_v58 = vld [vmem:[#allocation10 + $0x30] sm:$0xff]  ;;  %v1014_v59 = vld [vmem:[#allocation10 + $0x38] sm:$0xff]  ;;  %v1196_v12 = vld [vmem:[#allocation10 + $0x108] sm:$0xff] }
  0xc8   : > { %2069 = vmatpush3.bf16.msra.mxu1 %v2066_v62  ;;  %2153 = vmatpush3.bf16.msra.mxu0 %v2150_v18  ;;  %v902_v62 = vld [vmem:[#allocation9 + $0x118] sm:$0xff]  ;;  %v2134_v18 = vpack.c.bf16 %v912_v17, %v911_v16 }
  0xc9   : > { %2071 = vmatprep.subr.bf16.mxu1 %v2070_v1  ;;  %2155 = vmatprep.subr.bf16.mxu0 %v2154_v21  ;;  %v2114_v63 = vpack.c.bf16 %v902_v62, %v901_v61  ;;  %v2186_v61 = vpack.c.bf16 %v1014_v59, %v1013_v58  ;;  %v1015_v62 = vld [vmem:[#allocation10 + $0x40] sm:$0xff]  ;;  %v1198_v16 = vld [vmem:[#allocation10 + $0x118] sm:$0xff] }
  0xcc   : > { %2073 = vmatpush3.bf16.msra.mxu1 %v2070_v1  ;;  %2157 = vmatpush3.bf16.msra.mxu0 %v2154_v21  ;;  %v903_v1 = vld [vmem:[#allocation9 + $0x120] sm:$0xff]  ;;  %v2138_v21 = vpack.c.bf16 %v914_v20, %v913_v19  ;;  %v1200_v20 = vld [vmem:[#allocation10 + $0x128] sm:$0xff] }
  0xcd   : > { %2075 = vmatprep.subr.bf16.mxu1 %v2074_v4  ;;  %2159 = vmatprep.subr.bf16.mxu0 %v2158_v24  ;;  %v1199_v19 = vld [vmem:[#allocation10 + $0x120] sm:$0xff] }
  0xd0   : > { %2077 = vmatpush3.bf16.msra.mxu1 %v2074_v4  ;;  %2161 = vmatpush3.bf16.msra.mxu0 %v2158_v24  ;;  %v2118_v4 = vpack.c.bf16 %v904_v2, %v903_v1  ;;  %v1037_v24 = vld [vmem:[#allocation10 + $0xd8] sm:$0xff]  ;;  %v1017_v1 = vld [vmem:[#allocation10 + $0x50] sm:$0xff] }
  0xd1   : > { %2079 = vmatprep.subr.bf16.mxu1 %v2078_v7  ;;  %v1018_v2 = vld [vmem:[#allocation10 + $0x58] sm:$0xff] }
 0x186   : > { %v1730_v25 = vpop.f32.mrb[0].mxu1 }
 0x187   : > { %v510_v26 = vpop.f32.mrb[1].mxu1 }
 0x192   : > { %v1768_v27 = vpop.f32.mrb[0].mxu0 }
 0x193   : > { %v2254_v29 = vadd.f32 %v1768_v27, %v1730_v25  ;;  %v683_v30 = vpop.f32.mrb[1].mxu0  ;;  %v2162_v25 = vpack.c.bf16 %v1037_v24, %v1036_v23  ;;  %v1039_v27 = vld [vmem:[#allocation10 + $0xe8] sm:$0xff]  ;;  %v1201_v23 = vld [vmem:[#allocation10 + $0x130] sm:$0xff]  ;;  %v1202_v24 = vld [vmem:[#allocation10 + $0x138] sm:$0xff] }
 0x194   : > { %v2255_v31 = vadd.f32 %v683_v30, %v510_v26  ;;  %v1038_v26 = vld [vmem:[#allocation10 + $0xe0] sm:$0xff]  ;;  %v1041_v30 = vld [vmem:[#allocation10 + $0xf8] sm:$0xff] }
 0x195   : > { %v702_v32 = vadd.f32 %v2254_v29, %v1551_v28  ;;  %2163 = vmatprep.subr.bf16.mxu0 %v2162_v25  ;;  %v1040_v29 = vld [vmem:[#allocation10 + $0xf0] sm:$0xff] }
 0x196   : > { %v701_v33 = vadd.f32 %v2255_v31, %v1551_v28  ;;  %2165 = vmatpush3.bf16.msra.mxu0 %v2162_v25  ;;  %v2166_v28 = vpack.c.bf16 %v1039_v27, %v1038_v26  ;;  %v2170_v31 = vpack.c.bf16 %v1041_v30, %v1040_v29  ;;  %v2218_v25 = vpack.c.bf16 %v1202_v24, %v1201_v23  ;;  %v1203_v26 = vld [vmem:[#allocation10 + $0x140] sm:$0xff]  ;;  %v1204_v27 = vld [vmem:[#allocation10 + $0x148] sm:$0xff]  ;;  %v1205_v29 = vld [vmem:[#allocation10 + $0x150] sm:$0xff] }
 0x197   : > { %v704_v36 = vmax.f32 %v702_v32, 0.0  ;;  %v1007_v32 = vld [vmem:[#allocation10] sm:$0xff]  ;;  %v1206_v30 = vld [vmem:[#allocation10 + $0x158] sm:$0xff] }
 0x198   : > { %v703_v37 = vmax.f32 %v701_v33, 0.0  ;;  %2167 = vmatprep.subr.bf16.mxu0 %v2166_v28  ;;  %v1008_v33 = vld [vmem:[#allocation10 + $0x8] sm:$0xff] }
 0x199   : > { %708 = vst [vmem:[#allocation3 + $0x9] sm:$0xff] %v704_v36  ;;  %v2174_v34 = vpack.c.bf16 %v1008_v33, %v1007_v32  ;;  %v1207_v32 = vld [vmem:[#allocation10 + $0x160] sm:$0xff]  ;;  %v1208_v33 = vld [vmem:[#allocation10 + $0x168] sm:$0xff] }
 0x19a   : > { %707 = vst [vmem:[#allocation3 + $0x1] sm:$0xff] %v703_v37  ;;  %1801 = vmatprep.mubr.f32.mxu1 %v703_v37  ;;  %2169 = vmatpush3.bf16.msra.mxu0 %v2166_v28  ;;  %v1303_v37 = vld [vmem:[#allocation12 + $0x10] sm:$0xff]  ;;  %v2222_v28 = vpack.c.bf16 %v1204_v27, %v1203_v26 }
 0x19b   : > { %1802 = vmatmul.mubr.f32.vlgmr.msra.gmra.mrb[2].mxu1 %v704_v36  ;;  %2171 = vmatprep.subr.bf16.mxu0 %v2170_v31 }
 0x19c   : > { %2081 = vmatpush3.bf16.msra.mxu1 %v2078_v7  ;;  %v2122_v7 = vpack.c.bf16 %v906_v6, %v905_v5  ;;  %v1020_v5 = vld [vmem:[#allocation10 + $0x68] sm:$0xff] }
 0x19d   : > { %2083 = vmatprep.subr.bf16.mxu1 %v2082_v38 }
 0x19e   : > { %2173 = vmatpush3.bf16.msra.mxu0 %v2170_v31  ;;  %v2226_v31 = vpack.c.bf16 %v1206_v30, %v1205_v29 }
 0x19f   : > { %2175 = vmatprep.subr.bf16.mxu0 %v2174_v34 }
 0x1a0   : > { %2085 = vmatpush3.bf16.msra.mxu1 %v2082_v38  ;;  %v897_v22 = vld [vmem:[#allocation3 + $0xa] sm:$0xff] }
 0x1a1   : > { %v709_v44 = vld [vmem:[#allocation3] sm:$0xff]  ;;  %2087 = vmatprep.subr.bf16.mxu1 %v2086_v41  ;;  %v710_v0 = vld [vmem:[#allocation3 + $0x8] sm:$0xff]  ;;  %v1304_v38 = vld [vmem:[#allocation12 + $0x18] sm:$0xff] }
 0x1a2   : > { %1836 = vmatprep.mubr.f32.mxu1 %v709_v44  ;;  %v896_v3 = vld [vmem:[#allocation3 + $0x2] sm:$0xff]  ;;  %v2242_v39 = vpack.c.bf16 %v1304_v38, %v1303_v37  ;;  %v1308_v44 = vld [vmem:[#allocation12 + $0x38] sm:$0xff] }
 0x1a4   : > { %2089 = vmatpush3.bf16.msra.mxu1 %v2086_v41  ;;  %v1306_v41 = vld [vmem:[#allocation12 + $0x28] sm:$0xff] }
 0x1a5   : > { %2091 = vmatprep.subr.bf16.mxu1 %v2090_v45  ;;  %v2246_v42 = vpack.c.bf16 %v1306_v41, %v1305_v40  ;;  %v1554_v40 = vld [vmem:[%s2971_s8] ss:$0 sm:$0xff] }
 0x1a8   : > { %2093 = vmatpush3.bf16.msra.mxu1 %v2090_v45  ;;  %v2250_v45 = vpack.c.bf16 %v1308_v44, %v1307_v43 }
 0x1a9   : > { %2095 = vmatprep.subr.bf16.mxu1 %v2094_v48 }
 0x1ac   : > { %2097 = vmatpush3.bf16.msra.mxu1 %v2094_v48 }
 0x1ad   : > { %2099 = vmatprep.subr.bf16.mxu1 %v2098_v51 }
 0x1b0   : > { %2101 = vmatpush3.bf16.msra.mxu1 %v2098_v51  ;;  %v1009_v51 = vld [vmem:[#allocation10 + $0x10] sm:$0xff] }
 0x1b1   : > { %2103 = vmatprep.subr.bf16.mxu1 %v2102_v54  ;;  %v2178_v55 = vpack.c.bf16 %v1010_v52, %v1009_v51 }
 0x1b4   : > { %2105 = vmatpush3.bf16.msra.mxu1 %v2102_v54 }
 0x1b5   : > { %2107 = vmatprep.subr.bf16.mxu1 %v2106_v57 }
 0x1b8   : > { %2109 = vmatpush3.bf16.msra.mxu1 %v2106_v57  ;;  %v1012_v57 = vld [vmem:[#allocation10 + $0x28] sm:$0xff] }
 0x1b9   : > { %2111 = vmatprep.subr.bf16.mxu1 %v2110_v60 }
 0x1bb   : > { %1837 = vmatmul.mubr.f32.vlgmr.msra.gmra.mrb[2].mxu1 %v710_v0 }
 0x1bc   : > { %2113 = vmatpush3.bf16.msra.mxu1 %v2110_v60  ;;  %1871 = vmatprep.mubr.f32.mxu1 %v896_v3  ;;  %v2194_v3 = vpack.c.bf16 %v1018_v2, %v1017_v1 }
 0x1bd   : > { %2115 = vmatprep.subr.bf16.mxu1 %v2114_v63 }
 0x1c0   : > { %2117 = vmatpush3.bf16.msra.mxu1 %v2114_v63  ;;  %v1016_v63 = vld [vmem:[#allocation10 + $0x48] sm:$0xff] }
 0x1c1   : > { %2119 = vmatprep.subr.bf16.mxu1 %v2118_v4  ;;  %v2190_v0 = vpack.c.bf16 %v1016_v63, %v1015_v62 }
 0x1c4   : > { %2121 = vmatpush3.bf16.msra.mxu1 %v2118_v4  ;;  %v1019_v4 = vld [vmem:[#allocation10 + $0x60] sm:$0xff] }
 0x1c5   : > { %2123 = vmatprep.subr.bf16.mxu1 %v2122_v7  ;;  %v2198_v6 = vpack.c.bf16 %v1020_v5, %v1019_v4 }
 0x1c8   : > { %2125 = vmatpush3.bf16.msra.mxu1 %v2122_v7  ;;  %v1021_v7 = vld [vmem:[#allocation10 + $0x70] sm:$0xff] }
 0x1c9   : > { %2127 = vmatprep.subr.bf16.mxu1 %v2126_v10  ;;  %v2202_v9 = vpack.c.bf16 %v1022_v8, %v1021_v7 }
 0x1cc   : > { %2129 = vmatpush3.bf16.msra.mxu1 %v2126_v10  ;;  %v1195_v10 = vld [vmem:[#allocation10 + $0x100] sm:$0xff] }
 0x1cd   : > { %2131 = vmatprep.subr.bf16.mxu1 %v2130_v15  ;;  %v2206_v14 = vpack.c.bf16 %v1196_v12, %v1195_v10 }
 0x1d0   : > { %2133 = vmatpush3.bf16.msra.mxu1 %v2130_v15  ;;  %v1197_v15 = vld [vmem:[#allocation10 + $0x110] sm:$0xff] }
 0x1d1   : > { %2135 = vmatprep.subr.bf16.mxu1 %v2134_v18  ;;  %v2210_v17 = vpack.c.bf16 %v1198_v16, %v1197_v15 }
 0x1d4   : > { %2137 = vmatpush3.bf16.msra.mxu1 %v2134_v18 }
 0x1d5   : > { %2139 = vmatprep.subr.bf16.mxu1 %v2138_v21 }
 0x1d8   : > { %2141 = vmatpush3.bf16.msra.mxu1 %v2138_v21 }
 0x1db   : > { %1872 = vmatmul.mubr.f32.vlgmr.msra.gmra.mrb[2].mxu1 %v897_v22  ;;  %v2214_v22 = vpack.c.bf16 %v1200_v20, %v1199_v19 }
 0x1dc   : > { %1995 = vmatprep.mubr.msk.f32.mxu1 %vm414_vm1, %v2881_v11  ;;  %v1301_v11 = vld [vmem:[#allocation12] sm:$0xff] }
 0x1dd   : > { %v2238_v36 = vpack.c.bf16 %v1302_v35, %v1301_v11  ;;  %v1209_v11 = vld [vmem:[#allocation10 + $0x170] sm:$0xff]  ;;  %v1210_v35 = vld [vmem:[#allocation10 + $0x178] sm:$0xff] }
 0x1df   : > { %2239 = vmatprep.subr.bf16.mxu1 %v2238_v36 }
 0x1e0   : > { %2241 = vmatpush3.bf16.msra.mxu1 %v2238_v36  ;;  %v2234_v36 = vpack.c.bf16 %v1210_v35, %v1209_v11 }
 0x1e1   : > { %2243 = vmatprep.subr.bf16.mxu1 %v2242_v39 }
 0x1e4   : > { %2245 = vmatpush3.bf16.msra.mxu1 %v2242_v39 }
 0x1e5   : > { %2247 = vmatprep.subr.bf16.mxu1 %v2246_v42 }
 0x1e8   : > { %2249 = vmatpush3.bf16.msra.mxu1 %v2246_v42  ;;  %v1553_v42 = vld [vmem:[%s2969_s6] ss:$0 sm:$0xff] }
 0x1e9   : > { %2251 = vmatprep.subr.bf16.mxu1 %v2250_v45 }
 0x1ec   : > { %2253 = vmatpush3.bf16.msra.mxu1 %v2250_v45 }
 0x1ef   : > { %1996 = vmatmul.mubr.msk.f32.vlgmr.msra.gmra.mrb[4].mxu1 %vm414_vm1, %v2885_v13  ;;  %v2182_v13 = vpack.c.bf16 %v1012_v57, %v1011_v56 }
 0x2ae   : > { %v1873_v47 = vpop.f32.mrb[2].mxu1 }
 0x2af   : > { %v1000_v48 = vadd.f32 %v1873_v47, %v1552_v46  ;;  %v981_v49 = vpop.f32.mrb[3].mxu1 }
 0x2b0   : > { %v999_v50 = vadd.f32 %v1552_v46, %v981_v49 }
 0x2b1   : > { %v1002_v53 = vmax.f32 %v1000_v48, 0.0 }
 0x2b2   : > { %v1001_v54 = vmax.f32 %v999_v50, 0.0 }
 0x2b3   : > { %1004 = vst [vmem:[#allocation3 + $0x9] sm:$0xff] %v1002_v53 }
 0x2b4   : > { %1003 = vst [vmem:[#allocation3 + $0x1] sm:$0xff] %v1001_v54  ;;  %1906 = vmatprep.mubr.f32.mxu0 %v1001_v54 }
 0x2b5   : > { %1907 = vmatmul.mubr.f32.vlgmr.msra.gmra.mrb[2].mxu0 %v1002_v53 }
 0x2b6   : > { %2177 = vmatpush3.bf16.msra.mxu0 %v2174_v34  ;;  %v2230_v34 = vpack.c.bf16 %v1208_v33, %v1207_v32 }
 0x2b7   : > { %2179 = vmatprep.subr.bf16.mxu0 %v2178_v55 }
 0x2ba   : > { %2181 = vmatpush3.bf16.msra.mxu0 %v2178_v55  ;;  %v1193_v37 = vld [vmem:[#allocation3 + $0xa] sm:$0xff] }
 0x2bb   : > { %v1005_v60 = vld [vmem:[#allocation3] sm:$0xff]  ;;  %2183 = vmatprep.subr.bf16.mxu0 %v2182_v13  ;;  %v1006_v18 = vld [vmem:[#allocation3 + $0x8] sm:$0xff] }
 0x2bc   : > { %1941 = vmatprep.mubr.f32.mxu0 %v1005_v60  ;;  %v1192_v21 = vld [vmem:[#allocation3 + $0x2] sm:$0xff] }
 0x2be   : > { %2185 = vmatpush3.bf16.msra.mxu0 %v2182_v13 }
 0x2bf   : > { %2187 = vmatprep.subr.bf16.mxu0 %v2186_v61 }
 0x2c2   : > { %2189 = vmatpush3.bf16.msra.mxu0 %v2186_v61  ;;  %v1997_v38 = vpop.f32.mrb[4].mxu1 }
 0x2c3   : > { %2191 = vmatprep.subr.bf16.mxu0 %v2190_v0  ;;  %v1388_v39 = vpop.f32.mrb[5].mxu1  ;;  %v1394_v41 = vadd.f32 %v1997_v38, %v1554_v40 }
 0x2c4   : > { %v1389_v43 = vadd.f32 %v1554_v40, %v1388_v39 }
 0x2c5   : > { %v1398_v45 = vmax.f32 %v1394_v41, 0.0 }
 0x2c6   : > { %2193 = vmatpush3.bf16.msra.mxu0 %v2190_v0  ;;  %v1397_v48 = vmax.f32 %v1389_v43, 0.0 }
 0x2c7   : > { %2195 = vmatprep.subr.bf16.mxu0 %v2194_v3 }
 0x2ca   : > { %2197 = vmatpush3.bf16.msra.mxu0 %v2194_v3 }
 0x2cb   : > { %2199 = vmatprep.subr.bf16.mxu0 %v2198_v6 }
 0x2ce   : > { %2201 = vmatpush3.bf16.msra.mxu0 %v2198_v6 }
 0x2cf   : > { %2203 = vmatprep.subr.bf16.mxu0 %v2202_v9 }
 0x2d2   : > { %2205 = vmatpush3.bf16.msra.mxu0 %v2202_v9 }
 0x2d3   : > { %2207 = vmatprep.subr.bf16.mxu0 %v2206_v14 }
 0x2d5   : > { %1942 = vmatmul.mubr.f32.vlgmr.msra.gmra.mrb[2].mxu0 %v1006_v18 }
 0x2d6   : > { %2209 = vmatpush3.bf16.msra.mxu0 %v2206_v14  ;;  %1976 = vmatprep.mubr.f32.mxu0 %v1192_v21 }
 0x2d7   : > { %2211 = vmatprep.subr.bf16.mxu0 %v2210_v17 }
 0x2da   : > { %2213 = vmatpush3.bf16.msra.mxu0 %v2210_v17 }
 0x2db   : > { %2215 = vmatprep.subr.bf16.mxu0 %v2214_v22 }
 0x2de   : > { %2217 = vmatpush3.bf16.msra.mxu0 %v2214_v22 }
 0x2df   : > { %2219 = vmatprep.subr.bf16.mxu0 %v2218_v25 }
 0x2e2   : > { %2221 = vmatpush3.bf16.msra.mxu0 %v2218_v25 }
 0x2e3   : > { %2223 = vmatprep.subr.bf16.mxu0 %v2222_v28 }
 0x2e6   : > { %2225 = vmatpush3.bf16.msra.mxu0 %v2222_v28 }
 0x2e7   : > { %2227 = vmatprep.subr.bf16.mxu0 %v2226_v31 }
 0x2ea   : > { %2229 = vmatpush3.bf16.msra.mxu0 %v2226_v31 }
 0x2eb   : > { %2231 = vmatprep.subr.bf16.mxu0 %v2230_v34 }
 0x2ee   : > { %2233 = vmatpush3.bf16.msra.mxu0 %v2230_v34 }
 0x2ef   : > { %2235 = vmatprep.subr.bf16.mxu0 %v2234_v36 }
 0x2f2   : > { %2237 = vmatpush3.bf16.msra.mxu0 %v2234_v36 }
 0x2f5   : > { %1977 = vmatmul.mubr.f32.vlgmr.msra.gmra.mrb[2].mxu0 %v1193_v37 }
 0x3c8   : > { %v1978_v44 = vpop.f32.mrb[2].mxu0 }
 0x3c9   : > { %v1296_v46 = vadd.f32 %v1978_v44, %v1553_v42  ;;  %v1277_v47 = vpop.f32.mrb[3].mxu0 }
 0x3ca   : > { %v1295_v49 = vadd.f32 %v1553_v42, %v1277_v47 }
 0x3cb   : > { %v1298_v50 = vmax.f32 %v1296_v46, 0.0 }
 0x3cc   : > { %v1297_v51 = vmax.f32 %v1295_v49, 0.0 }
 0x3cd   : > { %v1400_v52 = vadd.f32 %v1398_v45, %v1298_v50 }
 0x3ce   : > { %v1399_v53 = vadd.f32 %v1397_v48, %v1297_v51 }
 0x3cf   : > { %1402 = vst [vmem:[%s408_s18 + $0x8] sm:$0xff] %v1400_v52 }
 0x3d0   : > { %1401 = vst [vmem:[%s408_s18] sm:$0xff] %v1399_v53 }
 0x3d1   : > { %2513 = shalt.err (!%p2510_p13)
}
 0x3d2   : > { %s2514_s22 = scalar_lea.hbm %s2919_s17, 256  ;;  %s2518_s18 = scalar_lea.hbm %s2996_s15, 512 }
 0x3d3   : > { %p2515_p9 = scmp.ne.s32.totalorder %s2919_s17, %s2514_s22  ;;  %p2519_p4 = scmp.lt.u32.totalorder %s2919_s17, %s2996_s15 }
 0x3d4   : > { %p2520_p8 = scmp.lt.u32.totalorder %s2518_s18, %s2514_s22  ;;  %p2522_p3 = scmp.lt.u32.totalorder %s2514_s22, %s2919_s17 }
 0x3d5   : > { %p2516_p0 = pnand %p2515_p9, %p2808_p10 }
 0x3d6   : > { %p2521_p6 = por %p2520_p8, %p2519_p4 }
 0x3d7   : > { %p2517_p11 = pneg %p2516_p0 }
 0x3d8   : > { %p2523_p5 = por %p2522_p3, %p2521_p6 }
 0x3da   : > { %p2524_p7 = pnand %p2523_p5, %p2517_p11 }
 0x3dc   : > { %2527 = shalt.err (!%p2524_p7)
}
 0x3dd   : > { %s2585_s9 = smov 128   ;;  %s2586_s25 = smov 8  }
 0x3de   : > { %2284 = dma.vmem_to_hbm [thread:$0]  (%p2808_p10), %s2914_s16, 256, %s2919_s17, %s1404_s21, %s2585_s9, %s2585_s9, %s2586_s25  }
 0x3df PF: > { %s2997_s13 = sld [smem:[#allocation18_spill]]  ;;  %s2998_s26 = sld [smem:[#allocation19_spill]] }
 0x3e0   : > { %p3000_p1 = scmp.ge.s32.totalorder %s2574_s12, 2 }
 0x3e5   : > { %s1432_s19 = sand.u32 1, %s2997_s13   ;;  %p2999_p12 = scmp.ne.s32.totalorder %s2998_s26, 0 }
 0x3e6   : > { %s1433_s22 = scalar_lea.sflag [#allocation6], %s1432_s19 }
 0x3e7   : > { %p2304_p2 = pnand %p3000_p1, %p2999_p12 }
 0x3e9   : > { %2557 = dma.done.wait (!%p2304_p2), %s1433_s22, 256  }
 0x3ea   : > { %2559 = vsyncadd (!%p2304_p2), %s1433_s22, 4294967040  ;;  %p24_p13 = scmp.ge.s32.totalorder %s2798_s14, 4   ;;  %s3001_s30 = smov %s2566_s10 }
 0x3eb   : > { %s3002_s10 = smov %s2570_s11  ;;  %s3003_s11 = smov %s2814_s28 }
 0x3ec   : > { %s3004_s12 = smov %s2798_s14  ;;  %26 = sbr.rel (!%p24_p13) target bundleno = 9 (0x9), region = 123 }
 0x3f3   :  { %1438 = vsyncpa [#allocation5], 1 }
 0x3f4   :  { %1440 = vsyncpa [#allocation5 + $0x1], 1 }
 0x3f5   :  { %1441 = vsyncpa [#allocation8], 1 }
 0x3f6   :  { %1442 = vsyncpa [#allocation11], 1 }
 0x3f7   :  { %1443 = vsyncpa [#allocation6], 1 }
 0x3f8   :  { %1445 = vsyncpa [#allocation6 + $0x1], 1 }

</bundles_post_ra>
